<compile_context>
chip_gen: v7x
topology: tpu7x:2x2x1
jax: 0.10.0
libtpu: 0.0.40
codegen_flags: <defaults>
</compile_context>

<pallas_src>
import functools

import jax
import jax.numpy as jnp
from jax.experimental import pallas as pl
from jax.experimental.pallas import tpu as pltpu

_LANES = 128
_TARGET_BLOCK_BYTES = 2 << 20  # ~2 MiB per buffer: past roofline knee, v5e-safe


# ----------------------------------------------------------------------------
# Kernels (elementwise, math in f32 in-register, I/O in original dtype)
# ----------------------------------------------------------------------------
def _fwd_kernel(x_ref, o_ref, *, beta):
    x = x_ref[...].astype(jnp.float32)
    z = jnp.exp((-1.702 * beta) * x)
    # Exact divide: memory-bound kernel -> the divide hides under DMA for free.
    o_ref[...] = (x / (1.0 + z)).astype(o_ref.dtype)


def _bwd_kernel(x_ref, g_ref, o_ref):
    g = g_ref[...]
    keep = x_ref[...] >= jnp.asarray(0.5, dtype=x_ref.dtype)
    o_ref[...] = jnp.where(keep, g, jnp.zeros_like(g))


# ----------------------------------------------------------------------------
# Plain-jnp fallbacks (used only for the <128-element unaligned tail)
# ----------------------------------------------------------------------------
def _fwd_ref(x, beta):
    xf = x.astype(jnp.float32)
    return (xf / (1.0 + jnp.exp((-1.702 * beta) * xf))).astype(x.dtype)


def _bwd_ref(x, g):
    return jnp.where(x >= jnp.asarray(0.5, dtype=x.dtype), g, jnp.zeros_like(g))


# ----------------------------------------------------------------------------
# Tiling helpers
# ----------------------------------------------------------------------------
def _pick_block_rows(rows, itemsize):
    """Dtype-aware block rows: ~2 MiB/buffer, >=2 grid steps when possible."""
    sub = max(8, 32 // itemsize)                      # sublane packing multiple
    br = max(2048, _TARGET_BLOCK_BYTES // (_LANES * itemsize))
    if rows <= br:
        if rows >= 2 * sub:
            # Split small/medium inputs into >=2 blocks so v7x's second
            # TensorCore gets work on the "parallel" grid axis.
            half = (rows + 1) // 2
            br = ((half + sub - 1) // sub) * sub
        else:
            br = rows                                  # full-dim block is legal
    return br


def _call_elementwise_2d(kernel, out_dtype, arrays):
    """Run an elementwise kernel over lane-aligned (rows, 128) views."""
    rows = arrays[0].shape[0]
    itemsize = jnp.dtype(arrays[0].dtype).itemsize
    br = _pick_block_rows(rows, itemsize)
    grid = (pl.cdiv(rows, br),)
    spec = pl.BlockSpec((br, _LANES), lambda i: (i, 0))
    # TODO(synk): optional tweaks not taken: pipeline_mode=pl.Buffered(3) on the
    # input spec and input_output_aliases={0: 0} for donated inputs (both small
    # / situational wins, keep only if they reproduce in measurement).
    return pl.pallas_call(
        kernel,
        out_shape=jax.ShapeDtypeStruct((rows, _LANES), out_dtype),
        grid_spec=pltpu.PrefetchScalarGridSpec(
            num_scalar_prefetch=0,
            grid=grid,
            in_specs=[spec] * len(arrays),
            out_specs=spec,
        ),
        compiler_params=pltpu.CompilerParams(
            dimension_semantics=("parallel",),   # lets v7x shard across 2 TCs
            vmem_limit_bytes=32 << 20,           # headroom; <=12 MiB actually used
        ),
    )(*arrays)


def _apply_elementwise(kernel, jnp_fallback, *arrays):
    """Shape plumbing: zero-copy when total size is lane-aligned."""
    shape = arrays[0].shape
    out_dtype = arrays[0].dtype
    n = arrays[0].size
    flats = [jnp.reshape(a, (-1,)) for a in arrays]
    tail = n % _LANES
    n_aligned = n - tail

    if n_aligned == 0:
        # Tiny (<128 element) input: not worth a kernel launch.
        return jnp.reshape(jnp_fallback(*flats), shape)

    if tail:
        heads = [jnp.reshape(f[:n_aligned], (-1, _LANES)) for f in flats]
    else:
        heads = [jnp.reshape(f, (-1, _LANES)) for f in flats]

    out_head = jnp.reshape(_call_elementwise_2d(kernel, out_dtype, heads), (-1,))

    if tail:
        # TODO(synk): tail handled in plain jnp; the concat still costs one pass
        # over the output for unaligned sizes (aligned sizes are fully zero-copy).
        out_tail = jnp_fallback(*[f[n_aligned:] for f in flats])
        out = jnp.concatenate([out_head, out_tail])
    else:
        out = out_head
    return jnp.reshape(out, shape)


# ----------------------------------------------------------------------------
# Public op with custom VJP matching the PyTorch module
# ----------------------------------------------------------------------------
@functools.partial(jax.custom_vjp, nondiff_argnums=(1,))
def _fwd_gelu_bwd_relu(x, beta):
    return _apply_elementwise(
        functools.partial(_fwd_kernel, beta=beta),
        functools.partial(_fwd_ref, beta=beta),
        x,
    )


def _vjp_fwd(x, beta):
    return _fwd_gelu_bwd_relu(x, beta), x


def _vjp_bwd(beta, x_saved, g):
    del beta  # backward mask does not depend on beta (matches the PyTorch Func)
    dx = _apply_elementwise(_bwd_kernel, _bwd_ref, x_saved, g)
    return (dx,)


_fwd_gelu_bwd_relu.defvjp(_vjp_fwd, _vjp_bwd)


def forward_gelu_backward_relu(x, beta=1.0):
    """ForwardGeLUBackwardReLU: SiLU-style forward, ReLU-masked (x>=0.5) backward.

    `beta` must be a static Python scalar (module hyperparameter), as in the
    PyTorch module's __init__.
    """
    return _fwd_gelu_bwd_relu(x, float(beta))


# ----------------------------------------------------------------------------
# Self-test
# ----------------------------------------------------------------------------
if __name__ == "__main__":
    key = jax.random.PRNGKey(0)
    # NCHW input matching the PyTorch module's elementwise use.
    x = jax.random.normal(key, (2, 4, 16, 16), dtype=jnp.float32)
    beta = 1.0  # module default (__init__ beta=1)

    # Forward
    y = jax.block_until_ready(forward_gelu_backward_relu(x, beta))
    ref = x / (1.0 + jnp.exp(-beta * x * 1.702))
    assert y.shape == x.shape and y.dtype == x.dtype
    fwd_err = float(jnp.max(jnp.abs(y - ref)))
    assert fwd_err < 1e-5, f"forward error too large: {fwd_err}"

    # Backward (ReLU-masked, x >= 0.5 keeps the gradient)
    g = jax.random.normal(jax.random.PRNGKey(1), x.shape, dtype=x.dtype)
    _, vjp_fn = jax.vjp(lambda t: forward_gelu_backward_relu(t, beta), x)
    (dx,) = vjp_fn(g)
    dx = jax.block_until_ready(dx)
    ref_dx = jnp.where(x >= 0.5, g, jnp.zeros_like(g))
    bwd_err = float(jnp.max(jnp.abs(dx - ref_dx)))
    assert bwd_err < 1e-6, f"backward error too large: {bwd_err}"

    print("KERNEL_OK")
</pallas_src>

<mosaic_0001>
module attributes {stable_mosaic.version = 11 : i64} {
  func.func @_fwd_kernel(%arg0: i32, %arg1: memref<8x128xf32, #tpu.memory_space<vmem>>, %arg2: memref<8x128xf32, #tpu.memory_space<vmem>>) attributes {dimension_semantics = [#tpu.dimension_semantics<parallel>], iteration_bounds = array<i64: 2>, scalar_prefetch = 0 : i64, scratch_operands = 0 : i64, tpu.core_type = #tpu.core_type<tc>, window_params = [{transform_indices = @transform_0, window_bounds = array<i64: 8, 128>}, {transform_indices = @transform_1, window_bounds = array<i64: 8, 128>}]} {
    %c0 = arith.constant 0 : index
    %c0_0 = arith.constant 0 : index
    %0 = vector.load %arg1[%c0, %c0_0] : memref<8x128xf32, #tpu.memory_space<vmem>>, vector<8x128xf32>
    %cst = arith.constant -1.702000e+00 : f32
    %1 = vector.broadcast %cst : f32 to vector<8x128xf32>
    %2 = arith.mulf %1, %0 : vector<8x128xf32>
    %3 = math.exp %2 : vector<8x128xf32>
    %cst_1 = arith.constant 1.000000e+00 : f32
    %4 = vector.broadcast %cst_1 : f32 to vector<8x128xf32>
    %5 = arith.addf %4, %3 : vector<8x128xf32>
    %6 = arith.divf %0, %5 : vector<8x128xf32>
    %c0_2 = arith.constant 0 : index
    %c0_3 = arith.constant 0 : index
    %7 = vector.load %arg2[%c0_2, %c0_3] : memref<8x128xf32, #tpu.memory_space<vmem>>, vector<8x128xf32>
    tpu.vector_store %arg2[%c0_2, %c0_3], %6 {strides = array<i32>} : memref<8x128xf32, #tpu.memory_space<vmem>>, vector<8x128xf32>,
    return
  }
  func.func @transform_0(%arg0: i32) -> (i32, i32) {
    %c0_i32 = arith.constant 0 : i32
    %c0_i32_0 = arith.constant 0 : i32
    return %arg0, %c0_i32 : i32, i32
  }
  func.func @transform_1(%arg0: i32) -> (i32, i32) {
    %c0_i32 = arith.constant 0 : i32
    %c0_i32_0 = arith.constant 0 : i32
    return %arg0, %c0_i32 : i32, i32
  }
}

</mosaic_0001>

<bundles_post_ra>
// kernel: tpu_custom_call.1
= control target key start
LH: loop header
LB: loop body
LE: loop exit
PB: predicated region body
PF: predicated region fallthrough
CT: control target
= control target key end

     0   :  { %6 = vsyncpa [#allocation3], 0  ;;  %s557_s0 = inlined_call_operand.hbm [shape: f32[16,128], index: 0, kind: input, shape index: {}]   ;;  %s558_s1 = inlined_call_operand.hbm [shape: f32[16,128], index: 1, kind: output, shape index: {}]  }
   0x1   :  { %8 = vsyncpa [#allocation3 + $0x1], 0 }
   0x2   :  { %9 = vsyncpa [#allocation4], 0 }
   0x3   :  { %11 = vsyncpa [#allocation4 + $0x1], 0  ;;  %s396_s6 = smov 0   ;;  %s398_s7 = smov 0  }
   0x4   :  { %s400_s8 = smov 0   ;;  %s402_s9 = smov 0  }
   0x5 LB: > { %s417_s10 = sadd.s32 4294967295, %s382_s9   ;;  %s224_s11 = sadd.s32 4294967294, %s382_s9   ;;  %s382_s9 = sphi %s402_s9, %s573_s9   ;;  %s378_s8 = sphi %s400_s8, %s572_s8   ;;  %s374_s7 = sphi %s398_s7, %s571_s7   ;;  %s370_s6 = sphi %s396_s6, %s570_s6  }
   0x6   : > { %s421_s12 = sadd.s32 1, %s382_s9   ;;  %s24_s13 = sadd.s32 1, %s378_s8 }
   0x7   : > { %s21_s14 = ssub.s32 %s382_s9, %s421_s12  ;;  %p31_p0 = scmp.ne.s32.totalorder %s378_s8, %s374_s7 }
   0x8   : > { %p22_p1 = scmp.eq.s32.totalorder %s21_s14, 0  ;;  %p32_p2 = scmp.eq.s32.totalorder %s382_s9, 0 }
   0x9   : > { %p37_p3 = scmp.ne.s32.totalorder %s374_s7, %s370_s6  ;;  %p38_p4 = scmp.eq.s32.totalorder %s417_s10, 0 }
   0xa   : > { %s433_s15 = scalar_select %p22_p1, %s378_s8, %s24_s13  }
   0xb   : > { %p435_p5 = por %p32_p2, %p31_p0  ;;  %p439_p6 = por %p38_p4, %p37_p3 }
   0xc   : > { %p61_p7 = scmp.eq.s32.totalorder %s417_s10, 1  ;;  %p67_p8 = scmp.eq.s32.totalorder %s224_s11, 1 }
   0xd   : > { %p248_p10 = scmp.lt.s32.totalorder %s382_s9, 2  ;;  %s87_s20 = sand.u32 1, %s378_s8  }
   0xe   : > { %p446_p11 = por %p61_p7, %p31_p0  ;;  %p450_p12 = por %p67_p8, %p37_p3 }
   0xf   : > { %s228_s21 = sshll.u32 %s382_s9, 7  ;;  %s227_s22 = sshll.u32 %s87_s20, 3 }
  0x10   : > { %s562_s18 = scalar_select %p446_p11, 1, 0 }
  0x11   : > { %s563_s19 = scalar_select %p450_p12, 1, 0 }
  0x12   : > { %s459_s25 = scalar_lea.hbm %s557_s0, %s228_s21  ;;  %s91_s26 = scalar_lea.vmem [#allocation2], %s227_s22 }
  0x13   : > { %s98_s27 = sshll.u32 %s91_s26, 4  ;;  %p463_p13 = pnand %p248_p10, %p435_p5  ;;  %s467_s27 = int_to_ptr.vmem [resolvable:$true] %s98_s27 }
  0x14   : > { %s88_s29 = scalar_lea.sflag [#allocation3], %s87_s20  ;;  %s286_s30 = scalar_lea.hbm %s459_s25, 128 }
  0x15   : > { %p287_p2 = scmp.ne.s32.totalorder %s459_s25, %s286_s30  ;;  %p288_p3 = pneg %p463_p13 }
  0x16   : > { %s291_s4 = scalar_lea.hbm %s557_s0, 256  ;;  %p292_p5 = scmp.lt.u32.totalorder %s459_s25, %s557_s0 }
  0x17   : > { %p289_p4 = pnand %p288_p3, %p287_p2  ;;  %p293_p8 = scmp.lt.u32.totalorder %s291_s4, %s286_s30 }
  0x18   : > { %p295_p9 = scmp.lt.u32.totalorder %s286_s30, %s459_s25 }
  0x19   : > { %p290_p7 = pneg %p289_p4  ;;  %p294_p10 = por %p293_p8, %p292_p5 }
  0x1b   : > { %p296_p0 = por %p295_p9, %p294_p10 }
  0x1d   : > { %p297_p1 = pnand %p296_p0, %p290_p7 }
  0x1f   : > { %300 = shalt.err (!%p297_p1)
}
  0x20   : > { %s301_s13 = scalar_lea.vmem %s467_s27, 128  ;;  %s384_s14 = smov [#allocation2]  }
  0x21   : > { %p302_p2 = scmp.ne.s32.totalorder %s467_s27, %s301_s13  ;;  %s306_s16 = sshll.u32 %s384_s14, 4  ;;  %s307_s16 = int_to_ptr.vmem [resolvable:$false] %s306_s16 }
  0x22   : > { %s308_s20 = scalar_lea.vmem %s307_s16, 256  ;;  %p309_p11 = scmp.lt.s32.totalorder %s467_s27, %s307_s16 }
  0x23   : > { %p304_p4 = pnand %p302_p2, %p288_p3  ;;  %p310_p5 = scmp.lt.s32.totalorder %s308_s20, %s301_s13 }
  0x25   : > { %p305_p12 = pneg %p304_p4  ;;  %p311_p8 = por %p310_p5, %p309_p11 }
  0x27   : > { %p312_p9 = pnand %p311_p8, %p305_p12 }
  0x29   : > { %315 = shalt.err (!%p312_p9)
}
  0x2a   : > { %243 = dma.hbm_to_vmem [thread:$0]  (!%p463_p13), %s459_s25, 128, %s467_s27, %s88_s29  }
  0x2b   : > { %p565_p0 = scmp.lt.s32.totalorder %s382_s9, 3  ;;  %p566_p1 = scmp.ge.s32.totalorder %s382_s9, 1 }
  0x2d   : > { %p104_p3 = pnand %p566_p1, %p565_p0 }
  0x2e   : > { %s501_s21 = sand.u32 (!%p104_p3), 1, %s374_s7  }
  0x2f   : > { %107 = sbr.rel (%p104_p3) target bundleno = 100 (0x64), region = 24  ;;  %s230_s22 = sshll.u32 (!%p104_p3), %s501_s21, 3 }
  0x30   : > { %s110_s23 = scalar_lea.sflag (!%p104_p3), [#allocation3], %s501_s21  ;;  %s113_s24 = scalar_lea.vmem (!%p104_p3), [#allocation2], %s230_s22 }
  0x36   : > { %361 = dma.done.wait (%p439_p6), %s110_s23, 128  }
  0x37   : > { %363 = vsyncadd (%p439_p6), %s110_s23, 4294967168  ;;  %v132_v0 = vld [vmem:[%s113_s24] sm:$0xff]  ;;  %s131_s25 = scalar_lea.vmem [#allocation5], %s230_s22  ;;  %s233_s27 = sshll.u32 %s417_s10, 7 }
  0x38   : > { %v133_v1 = vmul.f32 -1.702, %v132_v0  ;;  %s154_s26 = sshll.u32 %s131_s25, 4  ;;  %s515_s29 = scalar_lea.hbm %s558_s1, %s233_s27  ;;  %s510_s26 = int_to_ptr.vmem [resolvable:$true] %s154_s26 }
  0x39   : > { %s141_s30 = scalar_lea.sflag [#allocation4], %s501_s21  ;;  %s316_s2 = scalar_lea.vmem %s510_s26, 128 }
  0x3a   : > { %v134_v2 = vmul.f32 1.442695, %v133_v1  ;;  %p317_p6 = scmp.ne.s32.totalorder %s510_s26, %s316_s2  ;;  %p567_p11 = scmp.ne.s32.totalorder %s562_s18, 0 }
  0x3b   : > { %s385_s10 = smov [#allocation5]  }
  0x3c   : > { %282 = vpow2.f32 %v134_v2  ;;  %p318_p12 = pnand %p317_p6, %p567_p11  ;;  %s320_s3 = sshll.u32 %s385_s10, 4  ;;  %s321_s3 = int_to_ptr.vmem [resolvable:$false] %s320_s3 }
  0x3d   : > { %s322_s4 = scalar_lea.vmem %s321_s3, 256  ;;  %p323_p7 = scmp.lt.s32.totalorder %s510_s26, %s321_s3 }
  0x3e   : > { %p319_p13 = pneg %p318_p12  ;;  %p324_p10 = scmp.lt.s32.totalorder %s322_s4, %s316_s2 }
  0x40   : > { %p325_p2 = por %p324_p10, %p323_p7 }
  0x42   : > { %p326_p4 = pnand %p325_p2, %p319_p13 }
  0x46   : > { %v283_v3 = vpop.eup %282 }
  0x47   : > { %v136_v4 = vadd.f32 1.0, %v283_v3 }
  0x49   : > { %284 = vrcp.f32 %v136_v4 }
  0x53   : > { %v285_v5 = vpop.eup %284 }
  0x54   : > { %v138_v6 = vmul.f32 %v285_v5, %v132_v0 }
  0x56   : > { %139 = vst [vmem:[%s131_s25] sm:$0xff] %v138_v6 }
  0x57   : > { %329 = shalt.err (!%p326_p4)
}
  0x58   : > { %s330_s5 = scalar_lea.hbm %s515_s29, 128  ;;  %s334_s14 = scalar_lea.hbm %s558_s1, 256 }
  0x59   : > { %p331_p5 = scmp.ne.s32.totalorder %s515_s29, %s330_s5  ;;  %p335_p0 = scmp.lt.u32.totalorder %s515_s29, %s558_s1 }
  0x5a   : > { %p336_p1 = scmp.lt.u32.totalorder %s334_s14, %s330_s5  ;;  %p338_p6 = scmp.lt.u32.totalorder %s330_s5, %s515_s29 }
  0x5b   : > { %p332_p8 = pnand %p331_p5, %p567_p11 }
  0x5c   : > { %p337_p3 = por %p336_p1, %p335_p0 }
  0x5d   : > { %p333_p9 = pneg %p332_p8 }
  0x5e   : > { %p339_p12 = por %p338_p6, %p337_p3 }
  0x60   : > { %p340_p13 = pnand %p339_p12, %p333_p9 }
  0x62   : > { %343 = shalt.err (!%p340_p13)
}
  0x63   : > { %238 = dma.vmem_to_hbm [thread:$0]  (%p567_p11), %s510_s26, 128, %s515_s29, %s141_s30  }
  0x64 PF: > { %s166_s21 = sand.u32 1, %s370_s6   ;;  %p568_p7 = scmp.ne.s32.totalorder %s563_s19, 0 }
  0x65   : > { %p569_p10 = scmp.ge.s32.totalorder %s382_s9, 2  ;;  %s167_s22 = scalar_lea.sflag [#allocation4], %s166_s21 }
  0x67   : > { %p245_p2 = pnand %p569_p10, %p568_p7 }
  0x69   : > { %365 = dma.done.wait (!%p245_p2), %s167_s22, 128  }
  0x6a   : > { %367 = vsyncadd (!%p245_p2), %s167_s22, 4294967168  ;;  %p14_p4 = scmp.ge.s32.totalorder %s421_s12, 4   ;;  %s570_s6 = smov %s374_s7 }
  0x6b   : > { %s571_s7 = smov %s378_s8  ;;  %s572_s8 = smov %s433_s15 }
  0x6c   : > { %s573_s9 = smov %s421_s12  ;;  %16 = sbr.rel (!%p14_p4) target bundleno = 5 (0x5), region = 69 }
  0x73   :  { %172 = vsyncpa [#allocation3], 1 }
  0x74   :  { %174 = vsyncpa [#allocation3 + $0x1], 1 }
  0x75   :  { %175 = vsyncpa [#allocation4], 1 }
  0x76   :  { %177 = vsyncpa [#allocation4 + $0x1], 1 }

</bundles_post_ra>
